<compile_context>
chip_gen: v5e
topology: v5e:2x2
jax: 0.10.0
libtpu: 0.0.40
codegen_flags: <defaults>
</compile_context>

<pallas_src>
import jax
import jax.numpy as jnp
from jax.experimental import pallas as pl
from jax.experimental.pallas import tpu as pltpu


LANE = 128        # class dim zero-padded to a full lane width (dense vst)
NEG_BIG = -1e30   # baked into padded bias lanes -> exp underflows to 0


def _round_up(v, m):
    return (v + m - 1) // m * m


def _vmem_limit_bytes():
    """Generation-aware scoped-VMEM limit (3/4 of physical, capped)."""
    try:
        cap = int(pltpu.get_tpu_info().vmem_capacity_bytes)
    except Exception:
        cap = 64 * 1024 * 1024  # conservative fallback (v7x per-TC)
    return max(32 * 1024 * 1024, min(cap * 3 // 4, 112 * 1024 * 1024))


# ----------------------------- kernels --------------------------------------


def gcn_fused_kernel(adj_ref, xw_ref, b1_ref, w2_ref, b2_ref, o_ref):
    """Small-graph path: both propagations + log_softmax, Ahat read once."""
    h = jnp.dot(adj_ref[...], xw_ref[...], preferred_element_type=jnp.float32)
    h = jnp.maximum(h + b1_ref[...], 0.0)                              # f32
    g = jnp.dot(h.astype(jnp.bfloat16), w2_ref[...],
                preferred_element_type=jnp.float32)                    # (N, LANE)
    z = jnp.dot(adj_ref[...], g.astype(jnp.bfloat16),
                preferred_element_type=jnp.float32)
    z = z + b2_ref[...]                                                # pad lanes -1e30
    m = jnp.max(z, axis=-1, keepdims=True)
    e = jnp.exp(z - m)
    lse = jnp.log(jnp.sum(e, axis=-1, keepdims=True))
    o_ref[...] = (z - m - lse).astype(o_ref.dtype)


def gcn_layer1_kernel(adj_ref, xw_ref, b1_ref, w2_ref, g_ref, acc_ref):
    """K-tiled: acc += Ahat[i,k] @ xw[k]; at last k: g[i] = relu(acc+b1) @ W2."""
    k = pl.program_id(1)

    @pl.when(k == 0)
    def _():
        acc_ref[...] = jnp.zeros_like(acc_ref)

    acc_ref[...] += jnp.dot(adj_ref[...], xw_ref[...],
                            preferred_element_type=jnp.float32)

    @pl.when(k == pl.num_programs(1) - 1)
    def _():
        h = jnp.maximum(acc_ref[...] + b1_ref[...], 0.0)               # f32
        g_ref[...] = jnp.dot(h.astype(jnp.bfloat16), w2_ref[...],
                             preferred_element_type=jnp.float32).astype(g_ref.dtype)


def gcn_layer2_kernel(adj_ref, g_ref, b2_ref, o_ref, acc_ref):
    """K-tiled: acc += Ahat[i,k] @ g[k]; at last k: log_softmax(acc + b2)."""
    k = pl.program_id(1)

    @pl.when(k == 0)
    def _():
        acc_ref[...] = jnp.zeros_like(acc_ref)

    acc_ref[...] += jnp.dot(adj_ref[...], g_ref[...],
                            preferred_element_type=jnp.float32)

    @pl.when(k == pl.num_programs(1) - 1)
    def _():
        z = acc_ref[...] + b2_ref[...]                                 # pad lanes -1e30
        m = jnp.max(z, axis=-1, keepdims=True)
        e = jnp.exp(z - m)
        lse = jnp.log(jnp.sum(e, axis=-1, keepdims=True))
        o_ref[...] = (z - m - lse).astype(o_ref.dtype)


# ----------------------------- wrapper ---------------------------------------


def gcn_forward(adj_norm, x, w1, b1, w2, b2, *,
                tile_m=None, tile_k=None, force_tiled=False):
    n, _ = x.shape
    hid = w1.shape[1]
    out_c = w2.shape[1]
    assert out_c <= LANE
    f32, bf16 = jnp.float32, jnp.bfloat16

    vmem_limit = _vmem_limit_bytes()

    # Hoisted feature transform (computed once, bf16 matmul operand).
    xw = jnp.dot(x.astype(bf16), w1.astype(bf16),
                 preferred_element_type=f32).astype(bf16)              # (n, hid)

    w2_p = jnp.pad(w2.astype(bf16), ((0, 0), (0, LANE - out_c)))       # (hid, LANE)
    b1_r = b1.reshape(1, hid).astype(f32)
    b2_p = jnp.concatenate(
        [b2.reshape(1, out_c).astype(f32),
         jnp.full((1, LANE - out_c), NEG_BIG, f32)], axis=1)           # (1, LANE)

    adj_bf = adj_norm.astype(bf16)

    # ---------------- fused single-kernel path (small graphs) ----------------
    n_sq = _round_up(n, LANE)
    fused_bytes = (2 * (n_sq * n_sq * 2 + n_sq * hid * 2)      # double-buffered inputs
                   + 2 * n_sq * LANE * 4                       # output buffers
                   + 4 * n_sq * LANE * 4)                      # f32 temps (h/g/z)
    if not force_tiled and fused_bytes <= vmem_limit // 2:
        adj_p = jnp.pad(adj_bf, ((0, n_sq - n), (0, n_sq - n)))
        xw_p = jnp.pad(xw, ((0, n_sq - n), (0, 0)))
        out_p = pl.pallas_call(
            gcn_fused_kernel,
            out_shape=jax.ShapeDtypeStruct((n_sq, LANE), f32),
            grid=(1,),
            in_specs=[pl.BlockSpec((n_sq, n_sq), lambda i: (0, 0)),
                      pl.BlockSpec((n_sq, hid), lambda i: (0, 0)),
                      pl.BlockSpec((1, hid), lambda i: (0, 0)),
                      pl.BlockSpec((hid, LANE), lambda i: (0, 0)),
                      pl.BlockSpec((1, LANE), lambda i: (0, 0))],
            out_specs=pl.BlockSpec((n_sq, LANE), lambda i: (0, 0)),
            compiler_params=pltpu.CompilerParams(
                dimension_semantics=("arbitrary",),
                vmem_limit_bytes=vmem_limit),
        )(adj_p, xw_p, b1_r, w2_p, b2_p)
        return out_p[:n, :out_c]

    # ---------------- two-pass K-tiled path (large graphs) -------------------
    if tile_m is None:
        tile_m = 512
    if tile_k is None:
        tile_k = 1024
    tile_m = max(16, _round_up(min(tile_m, n), 16))      # bf16 sublane packing
    tile_k = max(LANE, _round_up(min(tile_k, n), LANE))  # lane alignment

    n_rows = _round_up(n, tile_m)   # dst padding (adj rows, g rows, out rows)
    n_cols = _round_up(n, tile_k)   # src padding (adj cols, xw rows)

    adj_p = jnp.pad(adj_bf, ((0, n_rows - n), (0, n_cols - n)))
    xw_p = jnp.pad(xw, ((0, n_cols - n), (0, 0)))

    grid = (n_rows // tile_m, n_cols // tile_k)
    cparams = pltpu.CompilerParams(
        dimension_semantics=("parallel", "arbitrary"),
        vmem_limit_bytes=vmem_limit)

    adj_spec = pl.BlockSpec((tile_m, tile_k), lambda i, k: (i, k))

    # Pass 1: g = relu(Ahat @ xw + b1) @ W2   (lane-dense bf16 slab in HBM)
    g = pl.pallas_call(
        gcn_layer1_kernel,
        out_shape=jax.ShapeDtypeStruct((n_rows, LANE), bf16),
        grid=grid,
        in_specs=[adj_spec,
                  pl.BlockSpec((tile_k, hid), lambda i, k: (k, 0)),
                  pl.BlockSpec((1, hid), lambda i, k: (0, 0)),
                  pl.BlockSpec((hid, LANE), lambda i, k: (0, 0))],
        out_specs=pl.BlockSpec((tile_m, LANE), lambda i, k: (i, 0)),
        scratch_shapes=[pltpu.VMEM((tile_m, hid), f32)],
        compiler_params=cparams,
    )(adj_p, xw_p, b1_r, w2_p)

    # Re-pad g's row dim to the source-node padding used by pass-2's K axis
    # (padded g rows multiply zero adjacency columns, so values are irrelevant).
    if n_cols < n_rows:
        g2 = g[:n_cols]
    elif n_cols > n_rows:
        g2 = jnp.pad(g, ((0, n_cols - n_rows), (0, 0)))
    else:
        g2 = g

    # Pass 2: out = log_softmax(Ahat @ g + b2)
    out_p = pl.pallas_call(
        gcn_layer2_kernel,
        out_shape=jax.ShapeDtypeStruct((n_rows, LANE), f32),
        grid=grid,
        in_specs=[adj_spec,
                  pl.BlockSpec((tile_k, LANE), lambda i, k: (k, 0)),
                  pl.BlockSpec((1, LANE), lambda i, k: (0, 0))],
        out_specs=pl.BlockSpec((tile_m, LANE), lambda i, k: (i, 0)),
        scratch_shapes=[pltpu.VMEM((tile_m, LANE), f32)],
        compiler_params=cparams,
    )(adj_p, g2, b2_p)

    return out_p[:n, :out_c]


# ----------------------------- graph / reference -----------------------------


def build_normalized_adjacency(edge_index, num_nodes):
    """Dense Ahat = D^{-1/2} (A + I) D^{-1/2}; rows = dst, cols = src.

    Note: strict PyG gcn_norm parity on directed edge lists is not guaranteed;
    the demo graphs below are undirected so the two agree.
    """
    src, dst = edge_index[0], edge_index[1]
    loop = jnp.arange(num_nodes, dtype=src.dtype)        # add_self_loops=True
    src = jnp.concatenate([src, loop])
    dst = jnp.concatenate([dst, loop])
    a = jnp.zeros((num_nodes, num_nodes), jnp.float32).at[dst, src].add(1.0)
    deg = a.sum(axis=1)
    dinv = jnp.where(deg > 0, 1.0 / jnp.sqrt(deg), 0.0)
    return dinv[:, None] * a * dinv[None, :]


def gcn_reference(adj, x, w1, b1, w2, b2):
    """Pure-JAX reference with the same bf16 rounding points as the kernels."""
    def _bf(a):
        return a.astype(jnp.bfloat16).astype(jnp.float32)

    adj_r, x_r, w1_r, w2_r = _bf(adj), _bf(x), _bf(w1), _bf(w2)
    xw = _bf(x_r @ w1_r)
    h1 = jnp.maximum(adj_r @ xw + b1.reshape(1, -1), 0.0)
    g = _bf(_bf(h1) @ w2_r)
    z = adj_r @ g + b2.reshape(1, -1)
    return jax.nn.log_softmax(z, axis=-1)


def _ring_graph(num_nodes, chord_src, chord_dst):
    ring_src = jnp.arange(num_nodes, dtype=jnp.int32)
    ring_dst = (ring_src + 1) % num_nodes
    cs = jnp.asarray(chord_src, jnp.int32)
    cd = jnp.asarray(chord_dst, jnp.int32)
    src = jnp.concatenate([ring_src, ring_dst, cs, cd])
    dst = jnp.concatenate([ring_dst, ring_src, cd, cs])
    return jnp.stack([src, dst])


# ----------------------------- demo ------------------------------------------


if __name__ == "__main__":
    key = jax.random.PRNGKey(0)
    k_x1, k_x2, k_w1, k_b1, k_w2, k_b2 = jax.random.split(key, 6)

    in_channels, hidden, out_channels = 3, 16, 7

    w1 = jax.random.normal(k_w1, (in_channels, hidden), jnp.float32) * (
        1.0 / jnp.sqrt(in_channels))
    b1 = 0.1 * jax.random.normal(k_b1, (1, hidden), jnp.float32)
    w2 = jax.random.normal(k_w2, (hidden, out_channels), jnp.float32) * (
        1.0 / jnp.sqrt(hidden))
    b2 = 0.1 * jax.random.normal(k_b2, (1, out_channels), jnp.float32)

    # --- Graph 1: 20 nodes -> auto selects the fused single-kernel path. -----
    n1 = 20
    x1 = jax.random.normal(k_x1, (n1, in_channels), jnp.float32)
    ei1 = _ring_graph(n1, [0, 5, 3], [10, 15, 12])
    adj1 = build_normalized_adjacency(ei1, n1)

    out1 = gcn_forward(adj1, x1, w1, b1, w2, b2)
    out1 = jax.block_until_ready(out1)
    ref1 = gcn_reference(adj1, x1, w1, b1, w2, b2)
    assert out1.shape == (n1, out_channels)
    assert jnp.allclose(out1, ref1, atol=2e-2, rtol=2e-2), "fused path mismatch"

    # --- Graph 2: 200 nodes, forced two-pass K-tiled path (tile_m=64, tile_k=128
    #     -> grid (4, 2): exercises row tiling, K accumulation and padding). ---
    n2 = 200
    x2 = jax.random.normal(k_x2, (n2, in_channels), jnp.float32)
    ei2 = _ring_graph(n2, [0, 50, 25, 7], [100, 150, 175, 111])
    adj2 = build_normalized_adjacency(ei2, n2)

    out2 = gcn_forward(adj2, x2, w1, b1, w2, b2,
                       tile_m=64, tile_k=128, force_tiled=True)
    out2 = jax.block_until_ready(out2)
    ref2 = gcn_reference(adj2, x2, w1, b1, w2, b2)
    assert out2.shape == (n2, out_channels)
    assert jnp.allclose(out2, ref2, atol=2e-2, rtol=2e-2), "tiled path mismatch"

    print("KERNEL_OK")
</pallas_src>

<mosaic_0001>
module attributes {stable_mosaic.version = 11 : i64} {
  func.func @gcn_fused_kernel(%arg0: i32, %arg1: memref<128x128xbf16, #tpu.memory_space<vmem>>, %arg2: memref<128x16xbf16, #tpu.memory_space<vmem>>, %arg3: memref<1x16xf32, #tpu.memory_space<vmem>>, %arg4: memref<16x128xbf16, #tpu.memory_space<vmem>>, %arg5: memref<1x128xf32, #tpu.memory_space<vmem>>, %arg6: memref<128x128xf32, #tpu.memory_space<vmem>>) attributes {dimension_semantics = [#tpu.dimension_semantics<arbitrary>], iteration_bounds = array<i64: 1>, scalar_prefetch = 0 : i64, scratch_operands = 0 : i64, tpu.core_type = #tpu.core_type<tc>, window_params = [{pipeline_mode = #tpu.pipeline_mode<synchronous>, transform_indices = @transform_0, window_bounds = array<i64: 128, 128>}, {pipeline_mode = #tpu.pipeline_mode<synchronous>, transform_indices = @transform_1, window_bounds = array<i64: 128, 16>}, {pipeline_mode = #tpu.pipeline_mode<synchronous>, transform_indices = @transform_2, window_bounds = array<i64: 1, 16>}, {pipeline_mode = #tpu.pipeline_mode<synchronous>, transform_indices = @transform_3, window_bounds = array<i64: 16, 128>}, {pipeline_mode = #tpu.pipeline_mode<synchronous>, transform_indices = @transform_4, window_bounds = array<i64: 1, 128>}, {pipeline_mode = #tpu.pipeline_mode<synchronous>, transform_indices = @transform_5, window_bounds = array<i64: 128, 128>}]} {
    %c0 = arith.constant 0 : index
    %c0_0 = arith.constant 0 : index
    %0 = vector.load %arg1[%c0, %c0_0] : memref<128x128xbf16, #tpu.memory_space<vmem>>, vector<128x128xbf16>
    %c0_1 = arith.constant 0 : index
    %c0_2 = arith.constant 0 : index
    %1 = vector.load %arg2[%c0_1, %c0_2] : memref<128x16xbf16, #tpu.memory_space<vmem>>, vector<128x16xbf16>
    %cst = arith.constant dense<0.000000e+00> : vector<128x16xf32>
    %2 = tpu.matmul %0, %1, %cst {dimension_numbers = #tpu.dot_dimension_numbers<[1], [0], [0], [1], [0, 0, 1, 1], [], []>} : vector<128x128xbf16>, vector<128x16xbf16>, vector<128x16xf32> -> vector<128x16xf32>
    %c0_3 = arith.constant 0 : index
    %c0_4 = arith.constant 0 : index
    %3 = vector.load %arg3[%c0_3, %c0_4] : memref<1x16xf32, #tpu.memory_space<vmem>>, vector<1x16xf32>
    %4 = vector.broadcast %3 : vector<1x16xf32> to vector<128x16xf32>
    %5 = arith.addf %2, %4 : vector<128x16xf32>
    %cst_5 = arith.constant 0.000000e+00 : f32
    %6 = vector.broadcast %cst_5 : f32 to vector<128x16xf32>
    %7 = arith.maximumf %5, %6 : vector<128x16xf32>
    %8 = arith.truncf %7 : vector<128x16xf32> to vector<128x16xbf16>
    %c0_6 = arith.constant 0 : index
    %c0_7 = arith.constant 0 : index
    %9 = vector.load %arg4[%c0_6, %c0_7] : memref<16x128xbf16, #tpu.memory_space<vmem>>, vector<16x128xbf16>
    %cst_8 = arith.constant dense<0.000000e+00> : vector<128x128xf32>
    %10 = tpu.matmul %8, %9, %cst_8 {dimension_numbers = #tpu.dot_dimension_numbers<[1], [0], [0], [1], [0, 0, 1, 1], [], []>} : vector<128x16xbf16>, vector<16x128xbf16>, vector<128x128xf32> -> vector<128x128xf32>
    %c0_9 = arith.constant 0 : index
    %c0_10 = arith.constant 0 : index
    %11 = vector.load %arg1[%c0_9, %c0_10] : memref<128x128xbf16, #tpu.memory_space<vmem>>, vector<128x128xbf16>
    %12 = arith.truncf %10 : vector<128x128xf32> to vector<128x128xbf16>
    %cst_11 = arith.constant dense<0.000000e+00> : vector<128x128xf32>
    %13 = tpu.matmul %11, %12, %cst_11 {dimension_numbers = #tpu.dot_dimension_numbers<[1], [0], [0], [1], [0, 0, 1, 1], [], []>} : vector<128x128xbf16>, vector<128x128xbf16>, vector<128x128xf32> -> vector<128x128xf32>
    %c0_12 = arith.constant 0 : index
    %c0_13 = arith.constant 0 : index
    %14 = vector.load %arg5[%c0_12, %c0_13] : memref<1x128xf32, #tpu.memory_space<vmem>>, vector<1x128xf32>
    %15 = vector.broadcast %14 : vector<1x128xf32> to vector<128x128xf32>
    %16 = arith.addf %13, %15 : vector<128x128xf32>
    %cst_14 = arith.constant dense<0xFF800000> : vector<128xf32>
    %17 = vector.multi_reduction <maximumf>, %16, %cst_14 [1] : vector<128x128xf32> to vector<128xf32>
    %18 = vector.shape_cast %17 : vector<128xf32> to vector<128x1xf32>
    %19 = vector.broadcast %18 : vector<128x1xf32> to vector<128x128xf32>
    %20 = arith.subf %16, %19 : vector<128x128xf32>
    %21 = math.exp %20 : vector<128x128xf32>
    %cst_15 = arith.constant dense<0.000000e+00> : vector<128xf32>
    %22 = vector.multi_reduction <add>, %21, %cst_15 [1] : vector<128x128xf32> to vector<128xf32>
    %23 = vector.shape_cast %22 : vector<128xf32> to vector<128x1xf32>
    %24 = math.log %23 : vector<128x1xf32>
    %25 = vector.broadcast %18 : vector<128x1xf32> to vector<128x128xf32>
    %26 = arith.subf %16, %25 : vector<128x128xf32>
    %27 = vector.broadcast %24 : vector<128x1xf32> to vector<128x128xf32>
    %28 = arith.subf %26, %27 : vector<128x128xf32>
    %c0_16 = arith.constant 0 : index
    %c0_17 = arith.constant 0 : index
    %29 = vector.load %arg6[%c0_16, %c0_17] : memref<128x128xf32, #tpu.memory_space<vmem>>, vector<128x128xf32>
    tpu.vector_store %arg6[%c0_16, %c0_17], %28 {strides = array<i32>} : memref<128x128xf32, #tpu.memory_space<vmem>>, vector<128x128xf32>,
    return
  }
  func.func @transform_0(%arg0: i32) -> (i32, i32) {
    %c0_i32 = arith.constant 0 : i32
    %c0_i32_0 = arith.constant 0 : i32
    %c0_i32_1 = arith.constant 0 : i32
    return %c0_i32, %c0_i32_0 : i32, i32
  }
  func.func @transform_1(%arg0: i32) -> (i32, i32) {
    %c0_i32 = arith.constant 0 : i32
    %c0_i32_0 = arith.constant 0 : i32
    %c0_i32_1 = arith.constant 0 : i32
    return %c0_i32, %c0_i32_0 : i32, i32
  }
  func.func @transform_2(%arg0: i32) -> (i32, i32) {
    %c0_i32 = arith.constant 0 : i32
    %c0_i32_0 = arith.constant 0 : i32
    %c0_i32_1 = arith.constant 0 : i32
    return %c0_i32, %c0_i32_0 : i32, i32
  }
  func.func @transform_3(%arg0: i32) -> (i32, i32) {
    %c0_i32 = arith.constant 0 : i32
    %c0_i32_0 = arith.constant 0 : i32
    %c0_i32_1 = arith.constant 0 : i32
    return %c0_i32, %c0_i32_0 : i32, i32
  }
  func.func @transform_4(%arg0: i32) -> (i32, i32) {
    %c0_i32 = arith.constant 0 : i32
    %c0_i32_0 = arith.constant 0 : i32
    %c0_i32_1 = arith.constant 0 : i32
    return %c0_i32, %c0_i32_0 : i32, i32
  }
  func.func @transform_5(%arg0: i32) -> (i32, i32) {
    %c0_i32 = arith.constant 0 : i32
    %c0_i32_0 = arith.constant 0 : i32
    %c0_i32_1 = arith.constant 0 : i32
    return %c0_i32, %c0_i32_0 : i32, i32
  }
}

</mosaic_0001>

<bundles_post_ra>
// kernel: tpu_custom_call.1
= control target key start
LH: loop header
LB: loop body
LE: loop exit
PB: predicated region body
PF: predicated region fallthrough
CT: control target
= control target key end

     0   :  { %s1005_s0 = inlined_call_operand.vmem [shape: bf16[128,128], index: 0, kind: input, shape index: {}]   ;;  %s1006_s1 = inlined_call_operand.vmem [shape: bf16[128,16], index: 1, kind: input, shape index: {}]   ;;  %s1007_s2 = inlined_call_operand.vmem [shape: f32[1,16], index: 2, kind: input, shape index: {}]   ;;  %s1008_s3 = inlined_call_operand.vmem [shape: bf16[16,128], index: 3, kind: input, shape index: {}]   ;;  %s1009_s4 = inlined_call_operand.vmem [shape: f32[1,128], index: 4, kind: input, shape index: {}]   ;;  %s1010_s5 = inlined_call_operand.hbm [shape: f32[128,128], index: 5, kind: output, shape index: {}]  }
   0x1   :  { %v655_v0 = vld [vmem:[%s1006_s1 + $0x38] sm:$0xff]  ;;  %v654_v1 = vld [vmem:[%s1006_s1 + $0x30] sm:$0xff] }
   0x2   :  { %154 = vmatpush.bf16.msra.mxu0 %v655_v0  ;;  %657 = vmatpush.bf16.msra.mxu3 %v655_v0 }
   0x3   :  { %10 = vsyncpa [#allocation3], 0  ;;  %v653_v2 = vld [vmem:[%s1006_s1 + $0x28] sm:$0xff]  ;;  %v652_v3 = vld [vmem:[%s1006_s1 + $0x20] sm:$0xff]  ;;  %vm235_vm0 = vcmask 130048   ;;  %s552_s30 = sshll.u32 %s1010_s5, 4  ;;  %s553_s30 = int_to_ptr.hbm [resolvable:$true] %s552_s30 }
   0x4   :  { %v651_v4 = vld [vmem:[%s1006_s1 + $0x18] sm:$0xff]  ;;  %v650_v5 = vld [vmem:[%s1006_s1 + $0x10] sm:$0xff]  ;;  %v649_v6 = vld [vmem:[%s1006_s1 + $0x8] sm:$0xff]  ;;  %s769_s6 = smov 128   ;;  %s770_s7 = smov 8  }
   0x5   :  { %v648_v7 = vld [vmem:[%s1006_s1] sm:$0xff]  ;;  %v834_v9 = vld [vmem:[%s1005_s0 + $0x8] sm:$0xff]  ;;  %v840_v10 = vld [vmem:[%s1005_s0 + $0x10] sm:$0xff] }
   0x6   :  { %155 = vmatpush.bf16.msra.mxu0 %v654_v1  ;;  %658 = vmatpush.bf16.msra.mxu3 %v654_v1  ;;  %v828_v8 = vld [vmem:[%s1005_s0] sm:$0xff]  ;;  %v846_v11 = vld [vmem:[%s1005_s0 + $0x18] sm:$0xff]  ;;  %v852_v12 = vld [vmem:[%s1005_s0 + $0x30] sm:$0xff] }
   0x7   :  { %v858_v13 = vld [vmem:[%s1005_s0 + $0x20] sm:$0xff]  ;;  %v863_v14 = vld [vmem:[%s1005_s0 + $0x38] sm:$0xff]  ;;  %v870_v15 = vld [vmem:[%s1005_s0 + $0x28] sm:$0xff] }
   0x8   :  { %v656_v16 = vld [vmem:[%s1008_s3] sm:$0xff]  ;;  %s768_s3 = smov [#allocation2]  }
   0x9   :  { %267 = vmatpush.bf16.msra.mxu1 %v656_v16  ;;  %v676_v18 = vld [vmem:[%s1007_s2] ss:$0 sm:$0xff] }
   0xa   :  { %156 = vmatpush.bf16.msra.mxu0 %v653_v2  ;;  %659 = vmatpush.bf16.msra.mxu3 %v653_v2 }
   0xe   :  { %157 = vmatpush.bf16.msra.mxu0 %v652_v3  ;;  %660 = vmatpush.bf16.msra.mxu3 %v652_v3 }
  0x12   :  { %158 = vmatpush.bf16.msra.mxu0 %v651_v4  ;;  %661 = vmatpush.bf16.msra.mxu3 %v651_v4 }
  0x16   :  { %159 = vmatpush.bf16.msra.mxu0 %v650_v5  ;;  %662 = vmatpush.bf16.msra.mxu3 %v650_v5 }
  0x1a   :  { %160 = vmatpush.bf16.msra.mxu0 %v649_v6  ;;  %663 = vmatpush.bf16.msra.mxu3 %v649_v6 }
  0x1e   :  { %161 = vmatpush.bf16.msra.mxu0 %v648_v7  ;;  %664 = vmatpush.bf16.msra.mxu3 %v648_v7 }
  0x21   :  { %162 = vmatmul.bf16.vlgmr.msra.gmra.mxu0 %v828_v8  ;;  %192 = vmatmul.bf16.vlgmr.msra.gmra.mxu3 %v852_v12 }
  0x31   :  { %167 = vmatmul.bf16.gmra.mxu0 %v834_v9  ;;  %197 = vmatmul.bf16.gmra.mxu3 %v863_v14 }
  0x41   :  { %172 = vmatmul.bf16.gmra.mxu0 %v840_v10 }
  0x51   :  { %177 = vmatmul.bf16.gmra.mxu0 %v846_v11 }
  0x61   :  { %182 = vmatmul.bf16.gmra.mxu0 %v858_v13 }
  0x71   :  { %187 = vmatmul.bf16.gmra.mxu0 %v870_v15 }
  0x9e   :  { %v163_v17 = vpop.f32.mrf.mxu0 }
  0x9f   :  { %v164_v19 = vadd.f32 %v676_v18, %v163_v17 }
  0xa1   :  { %v203_v22 = vmax.f32 %v164_v19, 0.0 }
  0xa4   :  { %v193_v54 = vpop.f32.mrf.mxu3 }
  0xa5   :  { %v194_v62 = vadd.f32 %v676_v18, %v193_v54 }
  0xa6   :  { %v165_v20 = vpop.f32.mrf.mxu0 }
  0xa7   :  { %v166_v21 = vadd.f32 %v676_v18, %v165_v20  ;;  %v215_v1 = vmax.f32 %v194_v62, 0.0 }
  0xa9   :  { %v204_v23 = vmax.f32 %v166_v21, 0.0 }
  0xab   :  { %v219_v24 = vpack.c.bf16 %v204_v23, %v203_v22 }
  0xac   :  { %v195_v61 = vpop.f32.mrf.mxu3 }
  0xad   :  { %632 = vmatmul.msk.bf16.vlgmr.msra.gmra.mxu1 %vm235_vm0, %v219_v24  ;;  %v196_v63 = vadd.f32 %v676_v18, %v195_v61 }
  0xae   :  { %v168_v25 = vpop.f32.mrf.mxu0 }
  0xaf   :  { %v169_v26 = vadd.f32 %v676_v18, %v168_v25  ;;  %v216_v2 = vmax.f32 %v196_v63, 0.0 }
  0xb1   :  { %v205_v29 = vmax.f32 %v169_v26, 0.0  ;;  %v225_v3 = vpack.c.bf16 %v216_v2, %v215_v1 }
  0xb4   :  { %v198_v0 = vpop.f32.mrf.mxu3 }
  0xb5   :  { %v199_v5 = vadd.f32 %v676_v18, %v198_v0 }
  0xb6   :  { %v170_v27 = vpop.f32.mrf.mxu0 }
  0xb7   :  { %v171_v28 = vadd.f32 %v676_v18, %v170_v27  ;;  %v217_v7 = vmax.f32 %v199_v5, 0.0 }
  0xb9   :  { %v206_v30 = vmax.f32 %v171_v28, 0.0 }
  0xbb   :  { %v220_v31 = vpack.c.bf16 %v206_v30, %v205_v29 }
  0xbc   :  { %v200_v4 = vpop.f32.mrf.mxu3 }
  0xbd   :  { %633 = vmatmul.msk.bf16.gmra.mxu1 %vm235_vm0, %v220_v31  ;;  %v201_v6 = vadd.f32 %v676_v18, %v200_v4 }
  0xbe   :  { %v173_v32 = vpop.f32.mrf.mxu0 }
  0xbf   :  { %v174_v33 = vadd.f32 %v676_v18, %v173_v32  ;;  %v218_v16 = vmax.f32 %v201_v6, 0.0 }
  0xc1   :  { %v207_v36 = vmax.f32 %v174_v33, 0.0  ;;  %v226_v17 = vpack.c.bf16 %v218_v16, %v217_v7 }
  0xc6   :  { %v175_v34 = vpop.f32.mrf.mxu0 }
  0xc7   :  { %v176_v35 = vadd.f32 %v676_v18, %v175_v34 }
  0xc9   :  { %v208_v37 = vmax.f32 %v176_v35, 0.0 }
  0xcb   :  { %v221_v38 = vpack.c.bf16 %v208_v37, %v207_v36 }
  0xcd   :  { %634 = vmatmul.msk.bf16.gmra.mxu1 %vm235_vm0, %v221_v38 }
  0xce   :  { %v178_v39 = vpop.f32.mrf.mxu0 }
  0xcf   :  { %v179_v40 = vadd.f32 %v676_v18, %v178_v39 }
  0xd1   :  { %v209_v43 = vmax.f32 %v179_v40, 0.0 }
  0xd6   :  { %v180_v41 = vpop.f32.mrf.mxu0 }
  0xd7   :  { %v181_v42 = vadd.f32 %v676_v18, %v180_v41 }
  0xd9   :  { %v210_v44 = vmax.f32 %v181_v42, 0.0  ;;  %v677_v42 = vld [vmem:[%s1009_s4] ss:$0 sm:$0xff]  ;;  %s550_s4 = sshll.u32 %s768_s3, 4  ;;  %s551_s4 = int_to_ptr.vmem [resolvable:$true] %s550_s4 }
  0xdb   :  { %v222_v45 = vpack.c.bf16 %v210_v44, %v209_v43 }
  0xdd   :  { %635 = vmatmul.msk.bf16.gmra.mxu1 %vm235_vm0, %v222_v45 }
  0xde   :  { %v183_v46 = vpop.f32.mrf.mxu0 }
  0xdf   :  { %v184_v47 = vadd.f32 %v676_v18, %v183_v46 }
  0xe1   :  { %v211_v50 = vmax.f32 %v184_v47, 0.0 }
  0xe6   :  { %v185_v48 = vpop.f32.mrf.mxu0 }
  0xe7   :  { %v186_v49 = vadd.f32 %v676_v18, %v185_v48 }
  0xe9   :  { %v212_v51 = vmax.f32 %v186_v49, 0.0 }
  0xeb   :  { %v223_v52 = vpack.c.bf16 %v212_v51, %v211_v50 }
  0xed   :  { %636 = vmatmul.msk.bf16.gmra.mxu1 %vm235_vm0, %v223_v52 }
  0xee   :  { %v188_v53 = vpop.f32.mrf.mxu0 }
  0xef   :  { %v189_v55 = vadd.f32 %v676_v18, %v188_v53 }
  0xf1   :  { %v213_v58 = vmax.f32 %v189_v55, 0.0 }
  0xf6   :  { %v190_v56 = vpop.f32.mrf.mxu0 }
  0xf7   :  { %v191_v57 = vadd.f32 %v676_v18, %v190_v56 }
  0xf9   :  { %v214_v59 = vmax.f32 %v191_v57, 0.0 }
  0xfb   :  { %v224_v60 = vpack.c.bf16 %v214_v59, %v213_v58 }
  0xfd   :  { %637 = vmatmul.msk.bf16.gmra.mxu1 %vm235_vm0, %v224_v60 }
 0x10d   :  { %638 = vmatmul.msk.bf16.gmra.mxu1 %vm235_vm0, %v225_v3 }
 0x11d   :  { %639 = vmatmul.msk.bf16.gmra.mxu1 %vm235_vm0, %v226_v17 }
 0x12a   :  { %v269_v19 = vpop.f32.mrf.mxu1 }
 0x132   :  { %v271_v20 = vpop.f32.mrf.mxu1 }
 0x133   :  { %v309_v21 = vpack.c.bf16 %v271_v20, %v269_v19 }
 0x13a   :  { %v274_v22 = vpop.f32.mrf.mxu1 }
 0x142   :  { %v276_v23 = vpop.f32.mrf.mxu1 }
 0x143   :  { %v310_v24 = vpack.c.bf16 %v276_v23, %v274_v22 }
 0x14a   :  { %v279_v25 = vpop.f32.mrf.mxu1 }
 0x152   :  { %v281_v26 = vpop.f32.mrf.mxu1 }
 0x153   :  { %v311_v27 = vpack.c.bf16 %v281_v26, %v279_v25 }
 0x15a   :  { %v284_v28 = vpop.f32.mrf.mxu1 }
 0x162   :  { %v286_v29 = vpop.f32.mrf.mxu1 }
 0x163   :  { %v312_v30 = vpack.c.bf16 %v286_v29, %v284_v28 }
 0x16a   :  { %v289_v31 = vpop.f32.mrf.mxu1 }
 0x172   :  { %v291_v32 = vpop.f32.mrf.mxu1 }
 0x173   :  { %v313_v41 = vpack.c.bf16 %v291_v32, %v289_v31 }
 0x17a   :  { %v294_v18 = vpop.f32.mrf.mxu1 }
 0x182   :  { %v296_v33 = vpop.f32.mrf.mxu1 }
 0x183   :  { %v314_v40 = vpack.c.bf16 %v296_v33, %v294_v18 }
 0x18a   :  { %v299_v34 = vpop.f32.mrf.mxu1 }
 0x192   :  { %v301_v35 = vpop.f32.mrf.mxu1 }
 0x193   :  { %v315_v39 = vpack.c.bf16 %v301_v35, %v299_v34 }
 0x19a   :  { %v304_v36 = vpop.f32.mrf.mxu1 }
 0x1a2   :  { %v306_v37 = vpop.f32.mrf.mxu1 }
 0x1a3   :  { %v316_v38 = vpack.c.bf16 %v306_v37, %v304_v36 }
 0x1a5   :  { %321 = vmatpush.bf16.msra.mxu2 %v316_v38  ;;  %665 = vmatpush.bf16.msrb.mxu3 %v316_v38 }
 0x1a9   :  { %322 = vmatpush.bf16.msra.mxu2 %v315_v39  ;;  %666 = vmatpush.bf16.msrb.mxu3 %v315_v39 }
 0x1ad   :  { %323 = vmatpush.bf16.msra.mxu2 %v314_v40  ;;  %667 = vmatpush.bf16.msrb.mxu3 %v314_v40 }
 0x1b1   :  { %324 = vmatpush.bf16.msra.mxu2 %v313_v41  ;;  %668 = vmatpush.bf16.msrb.mxu3 %v313_v41 }
 0x1b5   :  { %325 = vmatpush.bf16.msra.mxu2 %v312_v30  ;;  %669 = vmatpush.bf16.msrb.mxu3 %v312_v30 }
 0x1b9   :  { %326 = vmatpush.bf16.msra.mxu2 %v311_v27  ;;  %670 = vmatpush.bf16.msrb.mxu3 %v311_v27 }
 0x1bd   :  { %327 = vmatpush.bf16.msra.mxu2 %v310_v24  ;;  %671 = vmatpush.bf16.msrb.mxu3 %v310_v24 }
 0x1c1   :  { %328 = vmatpush.bf16.msra.mxu2 %v309_v21  ;;  %672 = vmatpush.bf16.msrb.mxu3 %v309_v21 }
 0x1c4   :  { %329 = vmatmul.bf16.vlgmr.msra.gmra.mxu2 %v828_v8  ;;  %359 = vmatmul.bf16.vlgmr.msrb.gmra.mxu3 %v852_v12 }
 0x1d4   :  { %334 = vmatmul.bf16.gmra.mxu2 %v834_v9  ;;  %364 = vmatmul.bf16.gmra.mxu3 %v863_v14 }
 0x1e4   :  { %339 = vmatmul.bf16.gmra.mxu2 %v840_v10 }
 0x1f4   :  { %344 = vmatmul.bf16.gmra.mxu2 %v846_v11 }
 0x204   :  { %349 = vmatmul.bf16.gmra.mxu2 %v858_v13 }
 0x214   :  { %354 = vmatmul.bf16.gmra.mxu2 %v870_v15 }
 0x247   :  { %v330_v43 = vpop.f32.mrf.mxu2  ;;  %v360_v12 = vpop.f32.mrf.mxu3 }
 0x248   :  { %v331_v8 = vadd.f32 %v677_v42, %v330_v43  ;;  %v361_v44 = vadd.f32 %v677_v42, %v360_v12 }
 0x24a   :  { %370 = vmax.xlane.f32.xlu0 %v331_v8 }
 0x24f   :  { %v332_v9 = vpop.f32.mrf.mxu2  ;;  %v362_v53 = vpop.f32.mrf.mxu3 }
 0x250   :  { %v333_v45 = vadd.f32 %v677_v42, %v332_v9  ;;  %v919_v0 = vadd.f32 %v677_v42, %v362_v53 }
 0x252   :  { %394 = vmax.xlane.f32.xlu0 %v361_v44 }
 0x257   :  { %v335_v14 = vpop.f32.mrf.mxu2  ;;  %v365_v56 = vpop.f32.mrf.mxu3 }
 0x258   :  { %v336_v10 = vadd.f32 %v677_v42, %v335_v14  ;;  %v925_v2 = vadd.f32 %v677_v42, %v365_v56 }
 0x25a   :  { %374 = vmax.xlane.f32.xlu1 %v336_v10  ;;  %372 = vmax.xlane.f32.xlu0 %v333_v45 }
 0x25f   :  { %v337_v11 = vpop.f32.mrf.mxu2  ;;  %v367_v59 = vpop.f32.mrf.mxu3 }
 0x260   :  { %v338_v13 = vadd.f32 %v677_v42, %v337_v11  ;;  %v913_v60 = vadd.f32 %v677_v42, %v367_v59 }
 0x262   :  { %376 = vmax.xlane.f32.xlu1 %v338_v13 }
 0x267   :  { %v340_v15 = vpop.f32.mrf.mxu2 }
 0x268   :  { %v341_v46 = vadd.f32 %v677_v42, %v340_v15 }
 0x26a   :  { %378 = vmax.xlane.f32.xlu2 %v341_v46 }
 0x26f   :  { %v342_v47 = vpop.f32.mrf.mxu2 }
 0x270   :  { %v898_v48 = vadd.f32 %v677_v42, %v342_v47 }
 0x272   :  { %380 = vmax.xlane.f32.xlu2 %v898_v48 }
 0x277   :  { %v345_v49 = vpop.f32.mrf.mxu2 }
 0x278   :  { %v901_v50 = vadd.f32 %v677_v42, %v345_v49 }
 0x27a   :  { %382 = vmax.xlane.f32.xlu0 %v901_v50 }
 0x27f   :  { %v347_v51 = vpop.f32.mrf.mxu2 }
 0x280   :  { %v904_v52 = vadd.f32 %v677_v42, %v347_v51 }
 0x282   :  { %384 = vmax.xlane.f32.xlu1 %v904_v52 }
 0x287   :  { %v350_v54 = vpop.f32.mrf.mxu2 }
 0x288   :  { %v907_v55 = vadd.f32 %v677_v42, %v350_v54 }
 0x28a   :  { %386 = vmax.xlane.f32.xlu2 %v907_v55 }
 0x28f   :  { %v352_v57 = vpop.f32.mrf.mxu2 }
 0x290   :  { %v910_v58 = vadd.f32 %v677_v42, %v352_v57 }
 0x292   :  { %388 = vmax.xlane.f32.xlu0 %v910_v58 }
 0x297   :  { %v355_v61 = vpop.f32.mrf.mxu2 }
 0x298   :  { %v915_v62 = vadd.f32 %v677_v42, %v355_v61 }
 0x29a   :  { %390 = vmax.xlane.f32.xlu1 %v915_v62  ;;  %400 = vmax.xlane.f32.xlu0 %v913_v60 }
 0x29f   :  { %v357_v63 = vpop.f32.mrf.mxu2 }
 0x2a0   :  { %v921_v1 = vadd.f32 %v677_v42, %v357_v63 }
 0x2a2   :  { %392 = vmax.xlane.f32.xlu2 %v921_v1  ;;  %396 = vmax.xlane.f32.xlu1 %v919_v0 }
 0x2aa   :  { %398 = vmax.xlane.f32.xlu2 %v925_v2 }
 0x2bd   :  { %v371_v3 = vpop.xlane.xlu0 %370 }
 0x2be   :  { %v928_v4 = vsub.f32 %v331_v8, %v371_v3 }
 0x2c0   :  { %v418_v5 = vmul.f32 1.442695, %v928_v4 }
 0x2c2   :  { %678 = vpow2.f32 %v418_v5 }
 0x2c5   :  { %v395_v6 = vpop.xlane.xlu0 %394 }
 0x2c6   :  { %v931_v7 = vsub.f32 %v361_v44, %v395_v6 }
 0x2c8   :  { %v679_v16 = vpop.eup %678  ;;  %v442_v17 = vmul.f32 1.442695, %v931_v7 }
 0x2c9   :  { %450 = vadd.xlane.f32.xlu1 %v679_v16 }
 0x2ca   :  { %680 = vpow2.f32 %v442_v17 }
 0x2cd   :  { %v375_v19 = vpop.xlane.xlu1 %374  ;;  %v373_v20 = vpop.xlane.xlu0 %372 }
 0x2ce   :  { %v934_v21 = vsub.f32 %v336_v10, %v375_v19  ;;  %v936_v22 = vsub.f32 %v333_v45, %v373_v20 }
 0x2d0   :  { %v681_v23 = vpop.eup %680  ;;  %v422_v24 = vmul.f32 1.442695, %v934_v21  ;;  %v420_v25 = vmul.f32 1.442695, %v936_v22 }
 0x2d1   :  { %474 = vadd.xlane.f32.xlu1 %v681_v23 }
 0x2d2   :  { %682 = vpow2.f32 %v422_v24 }
 0x2d3   :  { %684 = vpow2.f32 %v420_v25 }
 0x2d5   :  { %v377_v26 = vpop.xlane.xlu1 %376 }
 0x2d6   :  { %v940_v27 = vsub.f32 %v338_v13, %v377_v26 }
 0x2d8   :  { %v683_v28 = vpop.eup %682  ;;  %v424_v29 = vmul.f32 1.442695, %v940_v27 }
 0x2d9   :  { %v685_v30 = vpop.eup %684  ;;  %454 = vadd.xlane.f32.xlu0 %v683_v28 }
 0x2da   :  { %686 = vpow2.f32 %v424_v29  ;;  %452 = vadd.xlane.f32.xlu2 %v685_v30 }
 0x2dd   :  { %v379_v31 = vpop.xlane.xlu2 %378 }
 0x2de   :  { %v943_v32 = vsub.f32 %v341_v46, %v379_v31 }
 0x2e0   :  { %v687_v18 = vpop.eup %686  ;;  %v426_v33 = vmul.f32 1.442695, %v943_v32 }
 0x2e1   :  { %456 = vadd.xlane.f32.xlu1 %v687_v18 }
 0x2e2   :  { %688 = vpow2.f32 %v426_v33 }
 0x2e5   :  { %v381_v34 = vpop.xlane.xlu2 %380 }
 0x2e6   :  { %v947_v35 = vsub.f32 %v898_v48, %v381_v34 }
 0x2e8   :  { %v689_v36 = vpop.eup %688  ;;  %v428_v37 = vmul.f32 1.442695, %v947_v35 }
 0x2e9   :  { %458 = vadd.xlane.f32.xlu2 %v689_v36 }
 0x2ea   :  { %690 = vpow2.f32 %v428_v37 }
 0x2ed   :  { %v383_v38 = vpop.xlane.xlu0 %382 }
 0x2ee   :  { %v951_v39 = vsub.f32 %v901_v50, %v383_v38 }
 0x2f0   :  { %v691_v40 = vpop.eup %690  ;;  %v430_v41 = vmul.f32 1.442695, %v951_v39 }
 0x2f1   :  { %460 = vadd.xlane.f32.xlu0 %v691_v40 }
 0x2f2   :  { %692 = vpow2.f32 %v430_v41 }
 0x2f5   :  { %v385_v42 = vpop.xlane.xlu1 %384 }
 0x2f6   :  { %v955_v43 = vsub.f32 %v904_v52, %v385_v42 }
 0x2f8   :  { %v693_v8 = vpop.eup %692  ;;  %v432_v12 = vmul.f32 1.442695, %v955_v43 }
 0x2f9   :  { %462 = vadd.xlane.f32.xlu1 %v693_v8 }
 0x2fa   :  { %694 = vpow2.f32 %v432_v12 }
 0x2fd   :  { %v387_v44 = vpop.xlane.xlu2 %386 }
 0x2fe   :  { %v959_v9 = vsub.f32 %v907_v55, %v387_v44 }
 0x300   :  { %v695_v14 = vpop.eup %694  ;;  %v434_v45 = vmul.f32 1.442695, %v959_v9 }
 0x301   :  { %464 = vadd.xlane.f32.xlu2 %v695_v14 }
 0x302   :  { %696 = vpow2.f32 %v434_v45 }
 0x305   :  { %v389_v10 = vpop.xlane.xlu0 %388 }
 0x306   :  { %v963_v11 = vsub.f32 %v910_v58, %v389_v10 }
 0x308   :  { %v697_v13 = vpop.eup %696  ;;  %v436_v15 = vmul.f32 1.442695, %v963_v11 }
 0x309   :  { %466 = vadd.xlane.f32.xlu0 %v697_v13 }
 0x30a   :  { %698 = vpow2.f32 %v436_v15 }
 0x30d   :  { %v391_v46 = vpop.xlane.xlu1 %390  ;;  %v401_v47 = vpop.xlane.xlu0 %400 }
 0x30e   :  { %v967_v48 = vsub.f32 %v915_v62, %v391_v46  ;;  %v970_v49 = vsub.f32 %v913_v60, %v401_v47 }
 0x310   :  { %v699_v50 = vpop.eup %698  ;;  %v438_v51 = vmul.f32 1.442695, %v967_v48  ;;  %v448_v52 = vmul.f32 1.442695, %v970_v49 }
 0x311   :  { %468 = vadd.xlane.f32.xlu1 %v699_v50 }
 0x312   :  { %700 = vpow2.f32 %v438_v51 }
 0x313   :  { %702 = vpow2.f32 %v448_v52 }
 0x315   :  { %v393_v53 = vpop.xlane.xlu2 %392  ;;  %v397_v54 = vpop.xlane.xlu1 %396 }
 0x316   :  { %v975_v55 = vsub.f32 %v921_v1, %v393_v53  ;;  %v978_v56 = vsub.f32 %v919_v0, %v397_v54 }
 0x318   :  { %v701_v57 = vpop.eup %700  ;;  %v440_v58 = vmul.f32 1.442695, %v975_v55  ;;  %v444_v59 = vmul.f32 1.442695, %v978_v56 }
 0x319   :  { %v703_v60 = vpop.eup %702  ;;  %470 = vadd.xlane.f32.xlu2 %v701_v57 }
 0x31a   :  { %704 = vpow2.f32 %v440_v58  ;;  %480 = vadd.xlane.f32.xlu1 %v703_v60 }
 0x31b   :  { %706 = vpow2.f32 %v444_v59 }
 0x31d   :  { %v399_v61 = vpop.xlane.xlu2 %398 }
 0x31e   :  { %v983_v62 = vsub.f32 %v925_v2, %v399_v61 }
 0x320   :  { %v705_v63 = vpop.eup %704  ;;  %v446_v1 = vmul.f32 1.442695, %v983_v62 }
 0x321   :  { %v707_v3 = vpop.eup %706  ;;  %472 = vadd.xlane.f32.xlu0 %v705_v63 }
 0x322   :  { %708 = vpow2.f32 %v446_v1  ;;  %476 = vadd.xlane.f32.xlu2 %v707_v3 }
 0x328   :  { %v709_v0 = vpop.eup %708 }
 0x329   :  { %478 = vadd.xlane.f32.xlu0 %v709_v0 }
 0x33c   :  { %v451_v5 = vpop.xlane.xlu1 %450 }
 0x33d   :  { %710 = vlog2.f32 %v451_v5 }
 0x343   :  { %v711_v6 = vpop.eup %710 }
 0x344   :  { %v483_v16 = vmul.f32 0.6931472, %v711_v6  ;;  %v475_v17 = vpop.xlane.xlu1 %474 }
 0x345   :  { %712 = vlog2.f32 %v475_v17 }
 0x346   :  { %v514_v19 = vsub.f32 %v928_v4, %v483_v16 }
 0x348   :  { %530 = vst [vmem:[#allocation2] sm:$0xff] %v514_v19 }
 0x34b   :  { %v713_v2 = vpop.eup %712 }
 0x34c   :  { %v507_v20 = vmul.f32 0.6931472, %v713_v2  ;;  %v455_v23 = vpop.xlane.xlu0 %454 }
 0x34d   :  { %v453_v24 = vpop.xlane.xlu2 %452  ;;  %714 = vlog2.f32 %v455_v23 }
 0x34e   :  { %v526_v25 = vsub.f32 %v931_v7, %v507_v20  ;;  %716 = vlog2.f32 %v453_v24 }
 0x350   :  { %542 = vst [vmem:[#allocation2 + $0x60] sm:$0xff] %v526_v25 }
 0x353   :  { %v715_v26 = vpop.eup %714 }
 0x354   :  { %v717_v28 = vpop.eup %716  ;;  %v487_v29 = vmul.f32 0.6931472, %v715_v26  ;;  %v457_v30 = vpop.xlane.xlu1 %456 }
 0x355   :  { %v485_v31 = vmul.f32 0.6931472, %v717_v28  ;;  %718 = vlog2.f32 %v457_v30 }
 0x356   :  { %v516_v18 = vsub.f32 %v934_v21, %v487_v29 }
 0x357   :  { %v515_v4 = vsub.f32 %v936_v22, %v485_v31 }
 0x358   :  { %532 = vst [vmem:[#allocation2 + $0x10] sm:$0xff] %v516_v18 }
 0x359   :  { %531 = vst [vmem:[#allocation2 + $0x8] sm:$0xff] %v515_v4 }
 0x35b   :  { %v719_v33 = vpop.eup %718 }
 0x35c   :  { %v489_v34 = vmul.f32 0.6931472, %v719_v33  ;;  %v459_v36 = vpop.xlane.xlu2 %458 }
 0x35d   :  { %720 = vlog2.f32 %v459_v36 }
 0x35e   :  { %v517_v7 = vsub.f32 %v940_v27, %v489_v34 }
 0x360   :  { %533 = vst [vmem:[#allocation2 + $0x18] sm:$0xff] %v517_v7 }
 0x363   :  { %v721_v37 = vpop.eup %720 }
 0x364   :  { %v491_v38 = vmul.f32 0.6931472, %v721_v37  ;;  %v461_v40 = vpop.xlane.xlu0 %460 }
 0x365   :  { %722 = vlog2.f32 %v461_v40 }
 0x366   :  { %v518_v41 = vsub.f32 %v943_v32, %v491_v38 }
 0x368   :  { %534 = vst [vmem:[#allocation2 + $0x20] sm:$0xff] %v518_v41 }
 0x36b   :  { %v723_v42 = vpop.eup %722 }
 0x36c   :  { %v493_v21 = vmul.f32 0.6931472, %v723_v42  ;;  %v463_v8 = vpop.xlane.xlu1 %462 }
 0x36d   :  { %724 = vlog2.f32 %v463_v8 }
 0x36e   :  { %v519_v22 = vsub.f32 %v947_v35, %v493_v21 }
 0x370   :  { %535 = vst [vmem:[#allocation2 + $0x28] sm:$0xff] %v519_v22 }
 0x373   :  { %v725_v12 = vpop.eup %724 }
 0x374   :  { %v495_v44 = vmul.f32 0.6931472, %v725_v12  ;;  %v465_v14 = vpop.xlane.xlu2 %464 }
 0x375   :  { %726 = vlog2.f32 %v465_v14 }
 0x376   :  { %v520_v27 = vsub.f32 %v951_v39, %v495_v44 }
 0x378   :  { %536 = vst [vmem:[#allocation2 + $0x30] sm:$0xff] %v520_v27 }
 0x37b   :  { %v727_v45 = vpop.eup %726 }
 0x37c   :  { %v497_v10 = vmul.f32 0.6931472, %v727_v45  ;;  %v467_v13 = vpop.xlane.xlu0 %466 }
 0x37d   :  { %728 = vlog2.f32 %v467_v13 }
 0x37e   :  { %v521_v32 = vsub.f32 %v955_v43, %v497_v10 }
 0x380   :  { %537 = vst [vmem:[#allocation2 + $0x38] sm:$0xff] %v521_v32 }
 0x383   :  { %v729_v15 = vpop.eup %728 }
 0x384   :  { %v499_v46 = vmul.f32 0.6931472, %v729_v15  ;;  %v469_v47 = vpop.xlane.xlu1 %468 }
 0x385   :  { %730 = vlog2.f32 %v469_v47 }
 0x386   :  { %v522_v35 = vsub.f32 %v959_v9, %v499_v46 }
 0x388   :  { %538 = vst [vmem:[#allocation2 + $0x40] sm:$0xff] %v522_v35 }
 0x38b   :  { %v731_v50 = vpop.eup %730 }
 0x38c   :  { %v501_v51 = vmul.f32 0.6931472, %v731_v50  ;;  %v471_v52 = vpop.xlane.xlu2 %470 }
 0x38d   :  { %732 = vlog2.f32 %v471_v52  ;;  %v481_v39 = vpop.xlane.xlu1 %480 }
 0x38e   :  { %v523_v53 = vsub.f32 %v963_v11, %v501_v51  ;;  %734 = vlog2.f32 %v481_v39 }
 0x390   :  { %539 = vst [vmem:[#allocation2 + $0x48] sm:$0xff] %v523_v53 }
 0x393   :  { %v733_v54 = vpop.eup %732 }
 0x394   :  { %v735_v57 = vpop.eup %734  ;;  %v503_v43 = vmul.f32 0.6931472, %v733_v54  ;;  %v473_v58 = vpop.xlane.xlu0 %472 }
 0x395   :  { %v513_v59 = vmul.f32 0.6931472, %v735_v57  ;;  %v477_v60 = vpop.xlane.xlu2 %476  ;;  %736 = vlog2.f32 %v473_v58 }
 0x396   :  { %v524_v61 = vsub.f32 %v967_v48, %v503_v43  ;;  %738 = vlog2.f32 %v477_v60 }
 0x397   :  { %v529_v9 = vsub.f32 %v970_v49, %v513_v59 }
 0x398   :  { %540 = vst [vmem:[#allocation2 + $0x50] sm:$0xff] %v524_v61 }
 0x399   :  { %545 = vst [vmem:[#allocation2 + $0x78] sm:$0xff] %v529_v9 }
 0x39b   :  { %v737_v63 = vpop.eup %736 }
 0x39c   :  { %v739_v1 = vpop.eup %738  ;;  %v505_v3 = vmul.f32 0.6931472, %v737_v63  ;;  %v479_v11 = vpop.xlane.xlu0 %478 }
 0x39d   :  { %v509_v0 = vmul.f32 0.6931472, %v739_v1  ;;  %740 = vlog2.f32 %v479_v11 }
 0x39e   :  { %v525_v5 = vsub.f32 %v975_v55, %v505_v3 }
 0x39f   :  { %v527_v6 = vsub.f32 %v978_v56, %v509_v0 }
 0x3a0   :  { %541 = vst [vmem:[#allocation2 + $0x58] sm:$0xff] %v525_v5 }
 0x3a1   :  { %543 = vst [vmem:[#allocation2 + $0x68] sm:$0xff] %v527_v6 }
 0x3a3   :  { %v741_v48 = vpop.eup %740 }
 0x3a4   :  { %v511_v49 = vmul.f32 0.6931472, %v741_v48 }
 0x3a6   :  { %v528_v16 = vsub.f32 %v983_v62, %v511_v49 }
 0x3a8   :  { %544 = vst [vmem:[#allocation2 + $0x70] sm:$0xff] %v528_v16 }
 0x3a9   :  { %558 = dma.vmem_to_hbm [thread:$0]  %s551_s4, 2048, %s553_s30, [#allocation3], %s769_s6, %s769_s6, %s770_s7  }
 0x3aa   :  { %766 = dma.done.wait [#allocation3], 2048  }
 0x3ab   :  { %767 = vsyncadd [#allocation3], 4294965248 }
 0x3ac   :  { %563 = vsyncpa [#allocation3], 1 }

</bundles_post_ra>
